<compile_context>
chip_gen: v7x
topology: tpu7x:2x2x1
jax: 0.10.0
libtpu: 0.0.40
codegen_flags: <defaults>
</compile_context>

<pallas_src>
import functools
import math

import jax
import jax.numpy as jnp
import numpy as np
from jax.experimental import pallas as pl
from jax.experimental.pallas import tpu as pltpu


def _round_up(n, m):
    return (n + m - 1) // m * m


def _mlp_nll_kernel(x_ref, t_ref, packa_ref, packb_ref, out_ref, loss_ref, *,
                    X_dim, Y_dim, H, N_total, tn,
                    r_w2, r_w3a, r_vec, r_w1, r_bhead, r_tile, r_rsel,
                    eps=1e-5):
    pid = pl.program_id(0)
    Y = Y_dim
    out_dim = Y + Y * (Y + 1) // 2

    x = x_ref[...]            # (tn, X_dim)  — no lane padding
    target = t_ref[...]       # (tn, Y)

    # Resident packed parameters (static slices of two consolidated operands).
    w2 = packa_ref[r_w2:r_w2 + H, :]
    w3a = packa_ref[r_w3a:r_w3a + H, :]
    b1 = packa_ref[r_vec + 0:r_vec + 1, :]
    g1 = packa_ref[r_vec + 1:r_vec + 2, :]
    be1 = packa_ref[r_vec + 2:r_vec + 3, :]
    b2 = packa_ref[r_vec + 3:r_vec + 4, :]
    g2 = packa_ref[r_vec + 4:r_vec + 5, :]
    be2 = packa_ref[r_vec + 5:r_vec + 6, :]
    b3a = packa_ref[r_vec + 6:r_vec + 7, :]
    w1 = packa_ref[r_w1:r_w1 + X_dim, :]

    w_head = packb_ref[0:H, :]                        # (H, out_dim + Y + Y*Y)
    b_head = packb_ref[r_bhead:r_bhead + 1, :]        # (1, out_dim + Y + Y*Y)
    tilesel = packb_ref[r_tile:r_tile + Y, 0:Y * Y]   # (Y, Y*Y)
    rsel = packb_ref[r_rsel:r_rsel + Y * Y, 0:Y]      # (Y*Y, Y)

    ones_h = jnp.ones((H, 1), jnp.float32)
    inv_h = 1.0 / H

    def layer_norm(h, g, b):
        # mean / E[h^2] via MXU row-sums; keeps the lane-sparse reductions off the XLU.
        s1 = jnp.dot(h, ones_h, preferred_element_type=jnp.float32)
        s2 = jnp.dot(h * h, ones_h, preferred_element_type=jnp.float32)
        mean = s1 * inv_h
        var = s2 * inv_h - mean * mean
        return (h - mean) * jax.lax.rsqrt(var + eps) * g + b

    # --- layer 0: Linear -> ReLU -> LayerNorm -> Dropout(0) ---
    h = jnp.dot(x, w1, preferred_element_type=jnp.float32) + b1
    h0 = layer_norm(jnp.maximum(h, 0.0), g1, be1)

    # --- layer 1 (residual): out = out + layer1(out) ---
    h = jnp.dot(h0, w2, preferred_element_type=jnp.float32) + b2
    out1 = h0 + layer_norm(jnp.maximum(h, 0.0), g2, be2)

    # --- last block: Linear -> ReLU -> Dropout(0) -> Linear (NLL selection folded in) ---
    h = jnp.maximum(jnp.dot(out1, w3a, preferred_element_type=jnp.float32) + b3a, 0.0)
    feat = jnp.dot(h, w_head, preferred_element_type=jnp.float32) + b_head
    # feat = [pred (out_dim) | raw diag d_i (Y) | strict-lower L[i,j] at col j*Y+i (Y*Y)]

    out_ref[...] = feat[:, :out_dim].astype(out_ref.dtype)   # narrow, unpadded store

    mu = feat[:, :Y]
    diag_raw = feat[:, out_dim:out_dim + Y]
    lt_off = feat[:, out_dim + Y:out_dim + Y + Y * Y]

    y_diff = mu - target
    # z_j = exp(d_j) * y_j + sum_{i>j} L[i,j] * y_i  (off-diag contraction on the idle MXU)
    y_tiled = jnp.dot(y_diff, tilesel, preferred_element_type=jnp.float32)   # col j*Y+i = y_i
    z_off = jnp.dot(lt_off * y_tiled, rsel, preferred_element_type=jnp.float32)
    z = jnp.exp(diag_raw) * y_diff + z_off

    logdet = -jnp.sum(diag_raw, axis=-1, keepdims=True)
    mahal = 0.5 * jnp.sum(z * z, axis=-1, keepdims=True)
    loss_rows = logdet + mahal + 0.5 * Y * math.log(2.0 * math.pi)   # (tn, 1)

    # Mask batch-padding rows, emit an independent per-tile scalar partial sum.
    row_ids = pid * tn + jax.lax.broadcasted_iota(jnp.int32, (tn, 1), 0)
    loss_rows = jnp.where(row_ids < N_total, loss_rows, 0.0)
    loss_ref[...] = jnp.sum(loss_rows, axis=0, keepdims=True).reshape(1, 1, 1)


def baseline_mlp_forward(x, target, params, *, tn=1024):
    N, X_dim = x.shape
    Y = target.shape[1]
    out_dim = Y + Y * (Y + 1) // 2
    H = params["w1"].shape[1]
    W_comb = out_dim + Y + Y * Y
    f32 = jnp.float32

    # Big batch tile (amortizes ~0.35us/step), capped at ceil(N/2) so the grid has >= 2
    # parallel tiles and both v7x TensorCores get work.
    tn = max(8, min(tn, _round_up(pl.cdiv(N, 2), 8)))
    Np = _round_up(N, tn)
    num_tiles = Np // tn

    pad = Np - N
    x_p = jnp.pad(x.astype(f32), ((0, pad), (0, 0)))
    t_p = jnp.pad(target.astype(f32), ((0, pad), (0, 0)))

    # --- packA: every H-wide parameter consolidated into one resident operand ---
    r_w2, r_w3a, r_vec = 0, H, 2 * H
    r_w1 = _round_up(r_vec + 7, 8)
    rows_a = _round_up(r_w1 + X_dim, 8)
    packa = jnp.zeros((rows_a, H), f32)
    packa = packa.at[r_w2:r_w2 + H].set(params["w2"].astype(f32))
    packa = packa.at[r_w3a:r_w3a + H].set(params["w3a"].astype(f32))
    for k, name in enumerate(("b1", "g1", "be1", "b2", "g2", "be2", "b3a")):
        packa = packa.at[r_vec + k].set(params[name].reshape(-1).astype(f32))
    packa = packa.at[r_w1:r_w1 + X_dim].set(params["w1"].astype(f32))

    # --- packB: head with NLL selection folded in + tiny tril-contraction constants ---
    # sel maps pred -> [raw diag d_i (Y) | strict-lower L[i,j] at column j*Y+i (Y*Y)];
    # tril element k <-> L[i,j], j <= i, k = i*(i+1)//2 + j; diag of row i at i*(i+3)//2.
    sel = np.zeros((out_dim, Y + Y * Y), np.float32)
    tilesel = np.zeros((Y, Y * Y), np.float32)
    rsel = np.zeros((Y * Y, Y), np.float32)
    for i in range(Y):
        sel[Y + i * (i + 3) // 2, i] = 1.0
        for j in range(i):
            sel[Y + i * (i + 1) // 2 + j, Y + j * Y + i] = 1.0
        for j in range(Y):
            tilesel[i, j * Y + i] = 1.0
            rsel[j * Y + i, j] = 1.0
    w3b = params["w3b"].astype(f32)
    b3b = params["b3b"].reshape(1, -1).astype(f32)
    sel = jnp.asarray(sel)
    w_head = jnp.concatenate([w3b, w3b @ sel], axis=1)   # (H, W_comb)
    b_head = jnp.concatenate([b3b, b3b @ sel], axis=1)   # (1, W_comb)

    r_bhead = H
    r_tile = _round_up(H + 1, 8)
    r_rsel = _round_up(r_tile + Y, 8)
    rows_b = _round_up(r_rsel + Y * Y, 8)
    packb = jnp.zeros((rows_b, W_comb), f32)
    packb = packb.at[0:H, :].set(w_head)
    packb = packb.at[r_bhead:r_bhead + 1, :].set(b_head)
    packb = packb.at[r_tile:r_tile + Y, 0:Y * Y].set(jnp.asarray(tilesel))
    packb = packb.at[r_rsel:r_rsel + Y * Y, 0:Y].set(jnp.asarray(rsel))

    kernel = functools.partial(
        _mlp_nll_kernel, X_dim=X_dim, Y_dim=Y, H=H, N_total=N, tn=tn,
        r_w2=r_w2, r_w3a=r_w3a, r_vec=r_vec, r_w1=r_w1,
        r_bhead=r_bhead, r_tile=r_tile, r_rsel=r_rsel)

    out_p, loss_parts = pl.pallas_call(
        kernel,
        grid=(num_tiles,),
        in_specs=[
            pl.BlockSpec((tn, X_dim), lambda i: (i, 0)),     # x (streamed, narrow)
            pl.BlockSpec((tn, Y), lambda i: (i, 0)),         # target (streamed, narrow)
            pl.BlockSpec((rows_a, H), lambda i: (0, 0)),     # resident params (fetched once)
            pl.BlockSpec((rows_b, W_comb), lambda i: (0, 0)),
        ],
        out_specs=[
            pl.BlockSpec((tn, out_dim), lambda i: (i, 0)),   # pred (narrow, no lane padding)
            pl.BlockSpec((1, 1, 1), lambda i: (i, 0, 0)),    # per-tile loss partial (scalar)
        ],
        out_shape=[
            jax.ShapeDtypeStruct((Np, out_dim), jnp.float32),
            jax.ShapeDtypeStruct((num_tiles, 1, 1), jnp.float32),
        ],
        compiler_params=pltpu.CompilerParams(
            dimension_semantics=("parallel",)),              # batch tiles shard across TCs
    )(x_p, t_p, packa, packb)

    out = out_p if Np == N else out_p[:N]
    loss = jnp.sum(loss_parts) / N
    return out, loss


def make_params(key, X_dim, Y_dim, hidden_dim=32):
    out_dim = Y_dim + Y_dim * (Y_dim + 1) // 2
    ks = jax.random.split(key, 8)
    s = 0.1
    return {
        "w1": s * jax.random.normal(ks[0], (X_dim, hidden_dim), jnp.float32),
        "b1": s * jax.random.normal(ks[1], (1, hidden_dim), jnp.float32),
        "g1": jnp.ones((1, hidden_dim), jnp.float32),
        "be1": jnp.zeros((1, hidden_dim), jnp.float32),
        "w2": s * jax.random.normal(ks[2], (hidden_dim, hidden_dim), jnp.float32),
        "b2": s * jax.random.normal(ks[3], (1, hidden_dim), jnp.float32),
        "g2": jnp.ones((1, hidden_dim), jnp.float32),
        "be2": jnp.zeros((1, hidden_dim), jnp.float32),
        "w3a": s * jax.random.normal(ks[4], (hidden_dim, hidden_dim), jnp.float32),
        "b3a": s * jax.random.normal(ks[5], (1, hidden_dim), jnp.float32),
        "w3b": s * jax.random.normal(ks[6], (hidden_dim, out_dim), jnp.float32),
        "b3b": s * jax.random.normal(ks[7], (1, out_dim), jnp.float32),
    }


def reference(x, target, p, eps=1e-5):
    """Pure-JAX reference of the same math (for a correctness check)."""
    def ln(h, g, b):
        m = h.mean(-1, keepdims=True)
        v = ((h - m) ** 2).mean(-1, keepdims=True)
        return (h - m) / jnp.sqrt(v + eps) * g + b

    h0 = ln(jax.nn.relu(x @ p["w1"] + p["b1"]), p["g1"], p["be1"])
    h1 = ln(jax.nn.relu(h0 @ p["w2"] + p["b2"]), p["g2"], p["be2"])
    out1 = h0 + h1
    h2 = jax.nn.relu(out1 @ p["w3a"] + p["b3a"])
    pred = h2 @ p["w3b"] + p["b3b"]

    Y = target.shape[1]
    mu = pred[:, :Y]
    tril = pred[:, Y:]
    N = pred.shape[0]
    L = jnp.zeros((N, Y, Y), jnp.float32)
    idx = 0
    for i in range(Y):
        for j in range(i + 1):
            val = tril[:, idx]
            if i == j:
                val = jnp.exp(val)
            L = L.at[:, i, j].set(val)
            idx += 1
    logdet = -jnp.sum(jnp.stack([tril[:, i * (i + 3) // 2] for i in range(Y)], -1), -1)
    yd = mu - target
    z = jnp.einsum("bij,bi->bj", L, yd)       # L^T y
    mahal = 0.5 * jnp.sum(z * z, axis=-1)
    loss = jnp.mean(logdet + mahal + 0.5 * Y * math.log(2.0 * math.pi))
    return pred, loss


if __name__ == "__main__":
    N, X_dim, Y_dim, H = 16, 5, 4, 32
    key = jax.random.PRNGKey(0)
    kx, kt, kp = jax.random.split(key, 3)
    x = jax.random.normal(kx, (N, X_dim), jnp.float32)
    target = jax.random.normal(kt, (N, Y_dim), jnp.float32)
    params = make_params(kp, X_dim, Y_dim, H)

    out, loss = baseline_mlp_forward(x, target, params)
    out = jax.block_until_ready(out)
    loss = jax.block_until_ready(loss)

    out_ref, loss_ref = reference(x, target, params)
    assert out.shape == (N, Y_dim + Y_dim * (Y_dim + 1) // 2)
    assert jnp.allclose(out, out_ref, rtol=1e-4, atol=1e-4)
    assert jnp.allclose(loss, loss_ref, rtol=1e-4, atol=1e-4)

    # TODO(synk): training-mode dropout (p>0) is not implemented; module default p=0 is identity.
    print("KERNEL_OK")
</pallas_src>

<mosaic_0001>
module attributes {stable_mosaic.version = 11 : i64} {
  func.func @_mlp_nll_kernel(%arg0: i32, %arg1: memref<8x5xf32, #tpu.memory_space<vmem>>, %arg2: memref<8x4xf32, #tpu.memory_space<vmem>>, %arg3: memref<80x32xf32, #tpu.memory_space<vmem>>, %arg4: memref<64x34xf32, #tpu.memory_space<vmem>>, %arg5: memref<8x14xf32, #tpu.memory_space<vmem>>, %arg6: memref<1x1x1xf32, #tpu.memory_space<vmem>>) attributes {dimension_semantics = [#tpu.dimension_semantics<parallel>], iteration_bounds = array<i64: 2>, scalar_prefetch = 0 : i64, scratch_operands = 0 : i64, tpu.core_type = #tpu.core_type<tc>, window_params = [{transform_indices = @transform_0, window_bounds = array<i64: 8, 5>}, {transform_indices = @transform_1, window_bounds = array<i64: 8, 4>}, {pipeline_mode = #tpu.pipeline_mode<synchronous>, transform_indices = @transform_2, window_bounds = array<i64: 80, 32>}, {pipeline_mode = #tpu.pipeline_mode<synchronous>, transform_indices = @transform_3, window_bounds = array<i64: 64, 34>}, {transform_indices = @transform_4, window_bounds = array<i64: 8, 14>}, {transform_indices = @transform_5, window_bounds = array<i64: 1, 1, 1>}]} {
    %c0 = arith.constant 0 : index
    %c0_0 = arith.constant 0 : index
    %0 = vector.load %arg1[%c0, %c0_0] : memref<8x5xf32, #tpu.memory_space<vmem>>, vector<8x5xf32>
    %c0_1 = arith.constant 0 : index
    %c0_2 = arith.constant 0 : index
    %1 = vector.load %arg2[%c0_1, %c0_2] : memref<8x4xf32, #tpu.memory_space<vmem>>, vector<8x4xf32>
    %c0_3 = arith.constant 0 : index
    %c0_4 = arith.constant 0 : index
    %2 = vector.load %arg3[%c0_3, %c0_4] : memref<80x32xf32, #tpu.memory_space<vmem>>, vector<32x32xf32>
    %c32 = arith.constant 32 : index
    %c0_5 = arith.constant 0 : index
    %3 = vector.load %arg3[%c32, %c0_5] : memref<80x32xf32, #tpu.memory_space<vmem>>, vector<32x32xf32>
    %c64 = arith.constant 64 : index
    %c0_6 = arith.constant 0 : index
    %4 = vector.load %arg3[%c64, %c0_6] : memref<80x32xf32, #tpu.memory_space<vmem>>, vector<1x32xf32>
    %c65 = arith.constant 65 : index
    %c0_7 = arith.constant 0 : index
    %5 = vector.load %arg3[%c65, %c0_7] : memref<80x32xf32, #tpu.memory_space<vmem>>, vector<1x32xf32>
    %c66 = arith.constant 66 : index
    %c0_8 = arith.constant 0 : index
    %6 = vector.load %arg3[%c66, %c0_8] : memref<80x32xf32, #tpu.memory_space<vmem>>, vector<1x32xf32>
    %c67 = arith.constant 67 : index
    %c0_9 = arith.constant 0 : index
    %7 = vector.load %arg3[%c67, %c0_9] : memref<80x32xf32, #tpu.memory_space<vmem>>, vector<1x32xf32>
    %c68 = arith.constant 68 : index
    %c0_10 = arith.constant 0 : index
    %8 = vector.load %arg3[%c68, %c0_10] : memref<80x32xf32, #tpu.memory_space<vmem>>, vector<1x32xf32>
    %c69 = arith.constant 69 : index
    %c0_11 = arith.constant 0 : index
    %9 = vector.load %arg3[%c69, %c0_11] : memref<80x32xf32, #tpu.memory_space<vmem>>, vector<1x32xf32>
    %c70 = arith.constant 70 : index
    %c0_12 = arith.constant 0 : index
    %10 = vector.load %arg3[%c70, %c0_12] : memref<80x32xf32, #tpu.memory_space<vmem>>, vector<1x32xf32>
    %c72 = arith.constant 72 : index
    %c0_13 = arith.constant 0 : index
    %11 = vector.load %arg3[%c72, %c0_13] : memref<80x32xf32, #tpu.memory_space<vmem>>, vector<5x32xf32>
    %c0_14 = arith.constant 0 : index
    %c0_15 = arith.constant 0 : index
    %12 = vector.load %arg4[%c0_14, %c0_15] : memref<64x34xf32, #tpu.memory_space<vmem>>, vector<32x34xf32>
    %c32_16 = arith.constant 32 : index
    %c0_17 = arith.constant 0 : index
    %13 = vector.load %arg4[%c32_16, %c0_17] : memref<64x34xf32, #tpu.memory_space<vmem>>, vector<1x34xf32>
    %c40 = arith.constant 40 : index
    %c0_18 = arith.constant 0 : index
    %14 = vector.load %arg4[%c40, %c0_18] : memref<64x34xf32, #tpu.memory_space<vmem>>, vector<4x16xf32>
    %c48 = arith.constant 48 : index
    %c0_19 = arith.constant 0 : index
    %15 = vector.load %arg4[%c48, %c0_19] : memref<64x34xf32, #tpu.memory_space<vmem>>, vector<16x4xf32>
    %cst = arith.constant 1.000000e+00 : f32
    %16 = vector.broadcast %cst : f32 to vector<32x1xf32>
    %cst_20 = arith.constant dense<0.000000e+00> : vector<8x32xf32>
    %17 = tpu.matmul %0, %11, %cst_20 {dimension_numbers = #tpu.dot_dimension_numbers<[1], [0], [0], [1], [0, 0, 1, 1], [], []>} : vector<8x5xf32>, vector<5x32xf32>, vector<8x32xf32> -> vector<8x32xf32>
    %18 = vector.broadcast %4 : vector<1x32xf32> to vector<8x32xf32>
    %19 = arith.addf %17, %18 : vector<8x32xf32>
    %cst_21 = arith.constant 0.000000e+00 : f32
    %20 = vector.broadcast %cst_21 : f32 to vector<8x32xf32>
    %21 = arith.maximumf %19, %20 : vector<8x32xf32>
    %cst_22 = arith.constant dense<0.000000e+00> : vector<8x1xf32>
    %22 = tpu.matmul %21, %16, %cst_22 {dimension_numbers = #tpu.dot_dimension_numbers<[1], [0], [0], [1], [0, 0, 1, 1], [], []>} : vector<8x32xf32>, vector<32x1xf32>, vector<8x1xf32> -> vector<8x1xf32>
    %23 = arith.mulf %21, %21 : vector<8x32xf32>
    %cst_23 = arith.constant dense<0.000000e+00> : vector<8x1xf32>
    %24 = tpu.matmul %23, %16, %cst_23 {dimension_numbers = #tpu.dot_dimension_numbers<[1], [0], [0], [1], [0, 0, 1, 1], [], []>} : vector<8x32xf32>, vector<32x1xf32>, vector<8x1xf32> -> vector<8x1xf32>
    %cst_24 = arith.constant 3.125000e-02 : f32
    %25 = vector.broadcast %cst_24 : f32 to vector<8x1xf32>
    %26 = arith.mulf %22, %25 : vector<8x1xf32>
    %cst_25 = arith.constant 3.125000e-02 : f32
    %27 = vector.broadcast %cst_25 : f32 to vector<8x1xf32>
    %28 = arith.mulf %24, %27 : vector<8x1xf32>
    %29 = arith.mulf %26, %26 : vector<8x1xf32>
    %30 = arith.subf %28, %29 : vector<8x1xf32>
    %31 = vector.broadcast %26 : vector<8x1xf32> to vector<8x32xf32>
    %32 = arith.subf %21, %31 : vector<8x32xf32>
    %cst_26 = arith.constant 9.99999974E-6 : f32
    %33 = vector.broadcast %cst_26 : f32 to vector<8x1xf32>
    %34 = arith.addf %30, %33 : vector<8x1xf32>
    %35 = math.rsqrt %34 : vector<8x1xf32>
    %36 = vector.broadcast %35 : vector<8x1xf32> to vector<8x32xf32>
    %37 = arith.mulf %32, %36 : vector<8x32xf32>
    %38 = vector.broadcast %5 : vector<1x32xf32> to vector<8x32xf32>
    %39 = arith.mulf %37, %38 : vector<8x32xf32>
    %40 = vector.broadcast %6 : vector<1x32xf32> to vector<8x32xf32>
    %41 = arith.addf %39, %40 : vector<8x32xf32>
    %cst_27 = arith.constant dense<0.000000e+00> : vector<8x32xf32>
    %42 = tpu.matmul %41, %2, %cst_27 {dimension_numbers = #tpu.dot_dimension_numbers<[1], [0], [0], [1], [0, 0, 1, 1], [], []>} : vector<8x32xf32>, vector<32x32xf32>, vector<8x32xf32> -> vector<8x32xf32>
    %43 = vector.broadcast %7 : vector<1x32xf32> to vector<8x32xf32>
    %44 = arith.addf %42, %43 : vector<8x32xf32>
    %cst_28 = arith.constant 0.000000e+00 : f32
    %45 = vector.broadcast %cst_28 : f32 to vector<8x32xf32>
    %46 = arith.maximumf %44, %45 : vector<8x32xf32>
    %cst_29 = arith.constant dense<0.000000e+00> : vector<8x1xf32>
    %47 = tpu.matmul %46, %16, %cst_29 {dimension_numbers = #tpu.dot_dimension_numbers<[1], [0], [0], [1], [0, 0, 1, 1], [], []>} : vector<8x32xf32>, vector<32x1xf32>, vector<8x1xf32> -> vector<8x1xf32>
    %48 = arith.mulf %46, %46 : vector<8x32xf32>
    %cst_30 = arith.constant dense<0.000000e+00> : vector<8x1xf32>
    %49 = tpu.matmul %48, %16, %cst_30 {dimension_numbers = #tpu.dot_dimension_numbers<[1], [0], [0], [1], [0, 0, 1, 1], [], []>} : vector<8x32xf32>, vector<32x1xf32>, vector<8x1xf32> -> vector<8x1xf32>
    %cst_31 = arith.constant 3.125000e-02 : f32
    %50 = vector.broadcast %cst_31 : f32 to vector<8x1xf32>
    %51 = arith.mulf %47, %50 : vector<8x1xf32>
    %cst_32 = arith.constant 3.125000e-02 : f32
    %52 = vector.broadcast %cst_32 : f32 to vector<8x1xf32>
    %53 = arith.mulf %49, %52 : vector<8x1xf32>
    %54 = arith.mulf %51, %51 : vector<8x1xf32>
    %55 = arith.subf %53, %54 : vector<8x1xf32>
    %56 = vector.broadcast %51 : vector<8x1xf32> to vector<8x32xf32>
    %57 = arith.subf %46, %56 : vector<8x32xf32>
    %cst_33 = arith.constant 9.99999974E-6 : f32
    %58 = vector.broadcast %cst_33 : f32 to vector<8x1xf32>
    %59 = arith.addf %55, %58 : vector<8x1xf32>
    %60 = math.rsqrt %59 : vector<8x1xf32>
    %61 = vector.broadcast %60 : vector<8x1xf32> to vector<8x32xf32>
    %62 = arith.mulf %57, %61 : vector<8x32xf32>
    %63 = vector.broadcast %8 : vector<1x32xf32> to vector<8x32xf32>
    %64 = arith.mulf %62, %63 : vector<8x32xf32>
    %65 = vector.broadcast %9 : vector<1x32xf32> to vector<8x32xf32>
    %66 = arith.addf %64, %65 : vector<8x32xf32>
    %67 = arith.addf %41, %66 : vector<8x32xf32>
    %cst_34 = arith.constant dense<0.000000e+00> : vector<8x32xf32>
    %68 = tpu.matmul %67, %3, %cst_34 {dimension_numbers = #tpu.dot_dimension_numbers<[1], [0], [0], [1], [0, 0, 1, 1], [], []>} : vector<8x32xf32>, vector<32x32xf32>, vector<8x32xf32> -> vector<8x32xf32>
    %69 = vector.broadcast %10 : vector<1x32xf32> to vector<8x32xf32>
    %70 = arith.addf %68, %69 : vector<8x32xf32>
    %cst_35 = arith.constant 0.000000e+00 : f32
    %71 = vector.broadcast %cst_35 : f32 to vector<8x32xf32>
    %72 = arith.maximumf %70, %71 : vector<8x32xf32>
    %cst_36 = arith.constant dense<0.000000e+00> : vector<8x34xf32>
    %73 = tpu.matmul %72, %12, %cst_36 {dimension_numbers = #tpu.dot_dimension_numbers<[1], [0], [0], [1], [0, 0, 1, 1], [], []>} : vector<8x32xf32>, vector<32x34xf32>, vector<8x34xf32> -> vector<8x34xf32>
    %74 = vector.broadcast %13 : vector<1x34xf32> to vector<8x34xf32>
    %75 = arith.addf %73, %74 : vector<8x34xf32>
    %76 = vector.extract_strided_slice %75 {offsets = [0, 0], sizes = [8, 14], strides = [1, 1]} : vector<8x34xf32> to vector<8x14xf32>
    %c0_37 = arith.constant 0 : index
    %c0_38 = arith.constant 0 : index
    %77 = vector.load %arg5[%c0_37, %c0_38] : memref<8x14xf32, #tpu.memory_space<vmem>>, vector<8x14xf32>
    tpu.vector_store %arg5[%c0_37, %c0_38], %76 {strides = array<i32>} : memref<8x14xf32, #tpu.memory_space<vmem>>, vector<8x14xf32>,
    %78 = vector.extract_strided_slice %75 {offsets = [0, 0], sizes = [8, 4], strides = [1, 1]} : vector<8x34xf32> to vector<8x4xf32>
    %79 = vector.extract_strided_slice %75 {offsets = [0, 14], sizes = [8, 4], strides = [1, 1]} : vector<8x34xf32> to vector<8x4xf32>
    %80 = vector.extract_strided_slice %75 {offsets = [0, 18], sizes = [8, 16], strides = [1, 1]} : vector<8x34xf32> to vector<8x16xf32>
    %81 = arith.subf %78, %1 : vector<8x4xf32>
    %cst_39 = arith.constant dense<0.000000e+00> : vector<8x16xf32>
    %82 = tpu.matmul %81, %14, %cst_39 {dimension_numbers = #tpu.dot_dimension_numbers<[1], [0], [0], [1], [0, 0, 1, 1], [], []>} : vector<8x4xf32>, vector<4x16xf32>, vector<8x16xf32> -> vector<8x16xf32>
    %83 = arith.mulf %80, %82 : vector<8x16xf32>
    %cst_40 = arith.constant dense<0.000000e+00> : vector<8x4xf32>
    %84 = tpu.matmul %83, %15, %cst_40 {dimension_numbers = #tpu.dot_dimension_numbers<[1], [0], [0], [1], [0, 0, 1, 1], [], []>} : vector<8x16xf32>, vector<16x4xf32>, vector<8x4xf32> -> vector<8x4xf32>
    %85 = math.exp %79 : vector<8x4xf32>
    %86 = arith.mulf %85, %81 : vector<8x4xf32>
    %87 = arith.addf %86, %84 : vector<8x4xf32>
    %cst_41 = arith.constant dense<0.000000e+00> : vector<8xf32>
    %88 = vector.multi_reduction <add>, %79, %cst_41 [1] : vector<8x4xf32> to vector<8xf32>
    %89 = vector.shape_cast %88 : vector<8xf32> to vector<8x1xf32>
    %cst_42 = arith.constant 0.000000e+00 : f32
    %90 = vector.broadcast %cst_42 : f32 to vector<8x1xf32>
    %91 = arith.subf %90, %89 : vector<8x1xf32>
    %92 = arith.mulf %87, %87 : vector<8x4xf32>
    %cst_43 = arith.constant dense<0.000000e+00> : vector<8xf32>
    %93 = vector.multi_reduction <add>, %92, %cst_43 [1] : vector<8x4xf32> to vector<8xf32>
    %94 = vector.shape_cast %93 : vector<8xf32> to vector<8x1xf32>
    %cst_44 = arith.constant 5.000000e-01 : f32
    %95 = vector.broadcast %cst_44 : f32 to vector<8x1xf32>
    %96 = arith.mulf %95, %94 : vector<8x1xf32>
    %97 = arith.addf %91, %96 : vector<8x1xf32>
    %cst_45 = arith.constant 3.67575407 : f32
    %98 = vector.broadcast %cst_45 : f32 to vector<8x1xf32>
    %99 = arith.addf %97, %98 : vector<8x1xf32>
    %c8_i32 = arith.constant 8 : i32
    %100 = arith.muli %arg0, %c8_i32 : i32
    %101 = tpu.iota {dimensions = array<i32: 0>} : vector<8x1xi32>
    %102 = vector.broadcast %100 : i32 to vector<8x1xi32>
    %103 = arith.addi %102, %101 : vector<8x1xi32>
    %c16_i32 = arith.constant 16 : i32
    %104 = vector.broadcast %c16_i32 : i32 to vector<8x1xi32>
    %105 = arith.cmpi slt, %103, %104 : vector<8x1xi32>
    %cst_46 = arith.constant 0.000000e+00 : f32
    %106 = vector.broadcast %cst_46 : f32 to vector<8x1xf32>
    %107 = arith.select %105, %99, %106 : vector<8x1xi1>, vector<8x1xf32>
    %cst_47 = arith.constant dense<0.000000e+00> : vector<1xf32>
    %108 = vector.multi_reduction <add>, %107, %cst_47 [0] : vector<8x1xf32> to vector<1xf32>
    %109 = vector.shape_cast %108 : vector<1xf32> to vector<1x1xf32>
    %110 = vector.shape_cast %109 : vector<1x1xf32> to vector<1x1x1xf32>
    %c0_48 = arith.constant 0 : index
    %c0_49 = arith.constant 0 : index
    %c0_50 = arith.constant 0 : index
    %111 = vector.load %arg6[%c0_48, %c0_49, %c0_50] : memref<1x1x1xf32, #tpu.memory_space<vmem>>, vector<1x1x1xf32>
    tpu.vector_store %arg6[%c0_48, %c0_49, %c0_50], %110 {strides = array<i32>} : memref<1x1x1xf32, #tpu.memory_space<vmem>>, vector<1x1x1xf32>,
    return
  }
  func.func @transform_0(%arg0: i32) -> (i32, i32) {
    %c0_i32 = arith.constant 0 : i32
    %c0_i32_0 = arith.constant 0 : i32
    return %arg0, %c0_i32 : i32, i32
  }
  func.func @transform_1(%arg0: i32) -> (i32, i32) {
    %c0_i32 = arith.constant 0 : i32
    %c0_i32_0 = arith.constant 0 : i32
    return %arg0, %c0_i32 : i32, i32
  }
  func.func @transform_2(%arg0: i32) -> (i32, i32) {
    %c0_i32 = arith.constant 0 : i32
    %c0_i32_0 = arith.constant 0 : i32
    %c0_i32_1 = arith.constant 0 : i32
    return %c0_i32, %c0_i32_0 : i32, i32
  }
  func.func @transform_3(%arg0: i32) -> (i32, i32) {
    %c0_i32 = arith.constant 0 : i32
    %c0_i32_0 = arith.constant 0 : i32
    %c0_i32_1 = arith.constant 0 : i32
    return %c0_i32, %c0_i32_0 : i32, i32
  }
  func.func @transform_4(%arg0: i32) -> (i32, i32) {
    %c0_i32 = arith.constant 0 : i32
    %c0_i32_0 = arith.constant 0 : i32
    return %arg0, %c0_i32 : i32, i32
  }
  func.func @transform_5(%arg0: i32) -> (i32, i32, i32) {
    %c0_i32 = arith.constant 0 : i32
    %c0_i32_0 = arith.constant 0 : i32
    %c0_i32_1 = arith.constant 0 : i32
    return %arg0, %c0_i32, %c0_i32_0 : i32, i32, i32
  }
}

</mosaic_0001>

<bundles_post_ra>
// kernel: tpu_custom_call.1
= control target key start
LH: loop header
LB: loop body
LE: loop exit
PB: predicated region body
PF: predicated region fallthrough
CT: control target
= control target key end

     0   :  { %11 = vsyncpa [#allocation3], 0  ;;  %s1869_s0 = inlined_call_operand.vmem [shape: f32[16,5], index: 0, kind: input, shape index: {}]   ;;  %s1870_s1 = inlined_call_operand.vmem [shape: f32[16,4], index: 1, kind: input, shape index: {}]   ;;  %s1871_s2 = inlined_call_operand.vmem [shape: f32[80,32], index: 2, kind: input, shape index: {}]   ;;  %s1872_s3 = inlined_call_operand.vmem [shape: f32[64,34], index: 3, kind: input, shape index: {}]   ;;  %s1873_s4 = inlined_call_operand.hbm [shape: f32[16,14], index: 4, kind: output, shape index: {0}]   ;;  %s1874_s5 = inlined_call_operand.vmem [shape: f32[2,1,1], index: 5, kind: output, shape index: {1}]  }
   0x1   :  { %13 = vsyncpa [#allocation3 + $0x1], 0  ;;  %s1622_s18 = smov 0   ;;  %s1624_s19 = smov 0  }
   0x2   :  { %s1626_s20 = smov 0   ;;  %s1628_s21 = smov 0  }
   0x3 LB: > { %s1643_s22 = sadd.s32 4294967295, %s1580_s21   ;;  %s1257_s23 = sadd.s32 4294967294, %s1580_s21   ;;  %s1580_s21 = sphi %s1628_s21, %s1880_s21   ;;  %s1576_s20 = sphi %s1626_s20, %s1879_s20   ;;  %s1572_s19 = sphi %s1624_s19, %s1878_s19   ;;  %s1568_s18 = sphi %s1622_s18, %s1877_s18  }
   0x4   : > { %s1647_s24 = sadd.s32 1, %s1580_s21   ;;  %s120_s25 = sadd.s32 1, %s1576_s20 }
   0x5   : > { %s117_s26 = ssub.s32 %s1580_s21, %s1647_s24  ;;  %p130_p0 = scmp.ne.s32.totalorder %s1576_s20, %s1572_s19 }
   0x6   : > { %p118_p1 = scmp.eq.s32.totalorder %s117_s26, 0  ;;  %p131_p2 = scmp.eq.s32.totalorder %s1643_s22, 1 }
   0x7   : > { %p136_p3 = scmp.ne.s32.totalorder %s1572_s19, %s1568_s18  ;;  %p137_p4 = scmp.eq.s32.totalorder %s1257_s23, 1 }
   0x8   : > { %s1658_s27 = scalar_select %p118_p1, %s1576_s20, %s120_s25  }
   0x9   : > { %p1660_p5 = por %p131_p2, %p130_p0  ;;  %p1664_p6 = por %p137_p4, %p136_p3 }
   0xa   : > { %p1260_p7 = scmp.ge.s32.totalorder %s1580_s21, 1  ;;  %p201_p8 = scmp.lt.s32.totalorder %s1580_s21, 3 }
   0xc   : > { %p202_p9 = pnand %p1260_p7, %p201_p8 }
   0xd   : > { %v263_v0 = vld [vmem:[%s1871_s2 + $0x48] sm:$0x1f] (!%p202_p9)  ;;  %vm280_vm0 = vcmask (!%p202_p9), 1044480   ;;  %p235_p10 = scmp.lt.s32.totalorder (!%p202_p9), %s1643_s22, 1  ;;  %v1582_v1 = vmov (!%p202_p9), 0.0   ;;  %vm1583_vm1 = vmmov (!%p202_p9), 0  }
   0xe   : > { %205 = sbr.rel (%p202_p9) target bundleno = 2675 (0xa73), region = 36  ;;  %1331 = vmatprep.subr.mxu0 (!%p202_p9), %v1582_v1  ;;  %1333 = vmatprep.mubr.msk.f32.mxu0 (!%p202_p9), %vm1583_vm1, %v1582_v1  ;;  %v1584_v2 = vmov (!%p202_p9), 0.0|0.0   ;;  %v1585_v3 = vmov (!%p202_p9), 1.0|1.0   ;;  %vm276_vm2 = vcmask (!%p202_p9), 39936   ;;  %vm355_vm3 = vcmask (!%p202_p9), 261120  }
   0xf   : > { %1332 = vmatpush3.msk.msra.mxu0 (!%p202_p9), %vm280_vm0, %v263_v0  ;;  %1425 = vmatprep.subr.bf16.mxu1 (!%p202_p9), %v1584_v2  ;;  %v1264_v5 = vld [vmem:[%s1871_s2 + $0x40] ss:$0 sm:$0xff] (!%p202_p9)  ;;  %v1586_v11 = vmov (!%p202_p9), 0   ;;  %v249_v20 = vld [vmem:[%s1871_s2 + $0x8] sm:$0xff] (!%p202_p9)  ;;  %v250_v25 = vld [vmem:[%s1871_s2 + $0x10] sm:$0xff] (!%p202_p9)  ;;  %vm947_vm4 = vcmask (!%p202_p9), 1043456  }
  0x10   : > { %1426 = vmatpush3.bf16.msra.mxu1 (!%p202_p9), %v1585_v3  ;;  %1429 = vmatprep.subr.bf16.mxu0 (!%p202_p9), %v1584_v2  ;;  %v248_v19 = vld [vmem:[%s1871_s2] sm:$0xff] (!%p202_p9)  ;;  %v251_v26 = vld [vmem:[%s1871_s2 + $0x18] sm:$0xff] (!%p202_p9)  ;;  %v253_v52 = vld [vmem:[%s1871_s2 + $0x28] sm:$0xff] (!%p202_p9)  ;;  %s227_s10 = sand.u32 (!%p202_p9), 1, %s1572_s19   ;;  %vm940_vm5 = vcmask (!%p202_p9), 113664   ;;  %vm943_vm6 = vcmask (!%p202_p9), 31744  }
  0x11   : > { %1427 = vmatprep.subr.bf16.mxu1 (!%p202_p9), %v1584_v2  ;;  %1344 = vmatprep.mubr.msk.f32.mxu1 (!%p202_p9), %vm1583_vm1, %v1582_v1  ;;  %v1434_v21 = vpack.c.bf16 (!%p202_p9), %v249_v20, %v248_v19  ;;  %v1437_v27 = vpack.c.bf16 (!%p202_p9), %v251_v26, %v250_v25  ;;  %v1269_v30 = vld [vmem:[%s1871_s2 + $0x41] ss:$0 sm:$0xff] (!%p202_p9)  ;;  %v1270_v33 = vld [vmem:[%s1871_s2 + $0x42] ss:$0 sm:$0xff] (!%p202_p9)  ;;  %v1271_v36 = vld [vmem:[%s1871_s2 + $0x43] ss:$0 sm:$0xff] (!%p202_p9) }
  0x12   : > { %1510 = vset.pattern.permute.xlu0 (!%p202_p9), %v1586_v11  ;;  %1511 = vset.pattern.permute.xlu1 (!%p202_p9), %v1586_v11  ;;  %v252_v51 = vld [vmem:[%s1871_s2 + $0x20] sm:$0xff] (!%p202_p9)  ;;  %v254_v55 = vld [vmem:[%s1871_s2 + $0x30] sm:$0xff] (!%p202_p9)  ;;  %v255_v56 = vld [vmem:[%s1871_s2 + $0x38] sm:$0xff] (!%p202_p9)  ;;  %s1801_s14 = sshll.u32 (!%p202_p9), %s227_s10, 3  ;;  %s1587_s30 = smov (!%p202_p9), 18   ;;  %vm1029_vm7 = vcmask (!%p202_p9), 130048  }
  0x13   : > { %v1448_v54 = vpack.c.bf16 (!%p202_p9), %v253_v52, %v252_v51  ;;  %v1451_v57 = vpack.c.bf16 (!%p202_p9), %v255_v56, %v254_v55  ;;  %v264_v58 = vld [vmem:[%s1872_s3] sm:$0xff] (!%p202_p9)  ;;  %v265_v59 = vld [vmem:[%s1872_s3 + $0x8] sm:$0xff] (!%p202_p9)  ;;  %s229_s17 = scalar_lea.vmem (!%p202_p9), [#allocation2], %s1801_s14  ;;  %s1588_s6 = smov (!%p202_p9), 14  }
  0x14   : > { %1428 = vmatpush3.bf16.msra.mxu1 (!%p202_p9), %v1585_v3  ;;  %v1454_v60 = vpack.c.bf16 (!%p202_p9), %v265_v59, %v264_v58  ;;  %v1275_v63 = vld [vmem:[%s1871_s2 + $0x44] ss:$0 sm:$0xff] (!%p202_p9)  ;;  %v1277_v11 = vld [vmem:[%s1871_s2 + $0x46] ss:$0 sm:$0xff] (!%p202_p9)  ;;  %s1589_s9 = smov (!%p202_p9), 114   ;;  %s1286_s12 = sshll.u32 (!%p202_p9), %s1643_s22, 7 }
  0x15   : > { %s1678_s7 = scalar_select %p235_p10, %s1643_s22, 1  ;;  %1433 = vmatprep.subr.bf16.mxu1 %v1584_v2 }
  0x16   : > { %s1148_s23 = scalar_lea.sflag [#allocation3], %s227_s10  ;;  %s1591_s26 = smov [#allocation2]  }
  0x17   : > { %s1262_s8 = sshll.u32 %s1678_s7, 3 }
  0x18   : > { %s238_s11 = scalar_lea.vmem %s1869_s0, %s1262_s8  ;;  %s242_s13 = scalar_lea.vmem %s1870_s1, %s1262_s8 }
  0x19   : > { %v246_v4 = vld [vmem:[%s238_s11] sm:$0xff]  ;;  %s1590_s11 = smov 110   ;;  %s1826_s8 = scalar_lea.hbm %s1873_s4, %s1286_s12 }
  0x1a   : > { %1334 = vmatmul.mubr.msk.f32.vlgmr.msra.gmra.mrb[0].mxu0 %vm276_vm2, %v246_v4  ;;  %v1276_v4 = vld [vmem:[%s1871_s2 + $0x45] ss:$0 sm:$0xff] }
  0x1b   : > { %1430 = vmatpush3.bf16.msra.mxu0 %v1585_v3  ;;  %1355 = vmatprep.mubr.msk.f32.mxu0 %vm1583_vm1, %v1582_v1 }
  0x1c   : > { %1431 = vmatprep.subr.bf16.mxu0 %v1584_v2 }
  0x1f   : > { %1432 = vmatpush3.bf16.msra.mxu0 %v1585_v3 }
  0x20   : > { %1439 = vmatprep.subr.bf16.mxu0 %v1584_v2 }
  0xed   : > { %v350_v6 = vpop.f32.mrb[0].mxu0 }
  0xee   : > { %v351_v7 = vadd.f32 %v1264_v5, %v350_v6  ;;  %v1335_v8 = vpop.f32.mrb[1].mxu0 }
  0xef   : > { %v266_v8 = vld [vmem:[%s1872_s3 + $0x10] sm:$0xff] }
  0xf0   : > { %v354_v9 = vmax.f32 %v351_v7, 0.0 }
  0xf2   : > { %v429_v10 = vmul.f32 %v354_v9, %v354_v9  ;;  %1345 = vmatmul.mubr.msk.f32.vlgmr.msra.gmra.mrb[0].mxu1 %vm355_vm3, %v354_v9 }
  0xf3   : > { %1366 = vmatprep.mubr.msk.f32.mxu1 %vm1583_vm1, %v1582_v1  ;;  %1435 = vmatpush3.bf16.msra.mxu1 %v1434_v21 }
  0xf4   : > { %1356 = vmatmul.mubr.msk.f32.vlgmr.msra.gmra.mrb[2].mxu0 %vm355_vm3, %v429_v10  ;;  %1436 = vmatprep.subr.bf16.mxu1 %v1584_v2 }
  0xf5   : > { %1440 = vmatpush3.bf16.msra.mxu0 %v1585_v3  ;;  %1377 = vmatprep.mubr.msk.f32.mxu0 %vm1583_vm1, %v1582_v1 }
  0xf6   : > { %1441 = vmatprep.subr.bf16.mxu0 %v1584_v2 }
  0xf7   : > { %1438 = vmatpush3.bf16.msra.mxu1 %v1437_v27 }
  0xf8   : > { %1443 = vmatprep.subr.bf16.mxu1 %v1584_v2 }
  0xf9   : > { %1442 = vmatpush3.bf16.msra.mxu0 %v1585_v3 }
  0xfa   : > { %1447 = vmatprep.subr.bf16.mxu0 %v1584_v2 }
 0x1c5   : > { %v425_v12 = vpop.f32.mrb[0].mxu1 }
 0x1c6   : > { %v503_v13 = vmul.f32 0.03125, %v425_v12  ;;  %v1346_v14 = vpop.f32.mrb[1].mxu1 }
 0x1c7   : > { %v499_v15 = vpop.f32.mrb[2].mxu0 }
 0x1c8   : > { %v505_v16 = vmul.f32 %v503_v13, %v503_v13  ;;  %v504_v17 = vmul.f32 0.03125, %v499_v15  ;;  %509 = vperm.xlu0 %1510, %v503_v13   ;;  %v1357_v18 = vpop.f32.mrb[3].mxu0 }
 0x1c9   : > { %v247_v18 = vld [vmem:[%s242_s13] sm:$0xff]  ;;  %s1164_s13 = sshll.u32 %s229_s17, 4  ;;  %s1165_s13 = int_to_ptr.vmem [resolvable:$true] %s1164_s13 }
 0x1ca   : > { %v506_v22 = vsub.f32 %v504_v17, %v505_v16  ;;  %v269_v16 = vld [vmem:[%s1872_s3 + $0x28] sm:$0xf]  ;;  %v1279_v17 = vld [vmem:[%s1872_s3 + $0x20] ss:$0 sm:$0xff]  ;;  %s1518_s25 = scalar_lea.vmem %s1165_s13, 128 }
 0x1cb   : > { %p1519_p11 = scmp.ne.s32.totalorder %s1165_s13, %s1518_s25 }
 0x1cc   : > { %v513_v23 = vadd.f32 1e-05, %v506_v22  ;;  %v270_v22 = vld [vmem:[%s1872_s3 + $0x30] sm:$0xff] }
 0x1cd   : > { %p1520_p12 = pnand %p1519_p11, %p1660_p5 }
 0x1ce   : > { %1512 = vrsqrt.f32 %v513_v23  ;;  %v271_v23 = vld [vmem:[%s1872_s3 + $0x38] sm:$0xff] }
 0x1cf   : > { %p1521_p13 = pneg %p1520_p12 }
 0x1d8   : > { %v1513_v24 = vpop.eup %1512 }
 0x1d9   : > { %517 = vperm.xlu0 %1510, %v1513_v24   ;;  %v1460_v24 = vpack.c.bf16 %v271_v23, %v270_v22 }
 0x247   : > { %v510_v28 = vpop.permute.xlu0 %509 }
 0x248   : > { %v512_v29 = vsub.f32 %v354_v9, %v510_v28  ;;  %v267_v9 = vld [vmem:[%s1872_s3 + $0x18] sm:$0xff] }
 0x249   : > { %v1457_v10 = vpack.c.bf16 %v267_v9, %v266_v8 }
 0x258   : > { %v518_v31 = vpop.permute.xlu0 %517 }
 0x259   : > { %v520_v32 = vmul.f32 %v518_v31, %v512_v29 }
 0x25b   : > { %v525_v34 = vmul.f32 %v1269_v30, %v520_v32 }
 0x25d   : > { %v530_v35 = vadd.f32 %v1270_v33, %v525_v34 }
 0x25f   : > { %1367 = vmatmul.mubr.msk.f32.vlgmr.msra.gmra.mrb[2].mxu1 %vm355_vm3, %v530_v35 }
 0x260   : > { %1444 = vmatpush3.bf16.msra.mxu1 %v1585_v3  ;;  %1388 = vmatprep.mubr.msk.f32.mxu1 %vm1583_vm1, %v1582_v1 }
 0x261   : > { %1445 = vmatprep.subr.bf16.mxu1 %v1584_v2 }
 0x264   : > { %1446 = vmatpush3.bf16.msra.mxu1 %v1585_v3 }
 0x265   : > { %1453 = vmatprep.subr.bf16.mxu1 %v1584_v2 }
 0x332   : > { %v604_v37 = vpop.f32.mrb[2].mxu1 }
 0x333   : > { %v605_v38 = vadd.f32 %v1271_v36, %v604_v37  ;;  %v1368_v39 = vpop.f32.mrb[3].mxu1 }
 0x335   : > { %v608_v40 = vmax.f32 %v605_v38, 0.0 }
 0x337   : > { %v682_v41 = vmul.f32 %v608_v40, %v608_v40  ;;  %1378 = vmatmul.mubr.msk.f32.vlgmr.msra.gmra.mrb[4].mxu0 %vm355_vm3, %v608_v40 }
 0x338   : > { %1399 = vmatprep.mubr.msk.f32.mxu0 %vm1583_vm1, %v1582_v1  ;;  %1449 = vmatpush3.bf16.msra.mxu0 %v1448_v54 }
 0x339   : > { %1389 = vmatmul.mubr.msk.f32.vlgmr.msra.gmra.mrb[4].mxu1 %vm355_vm3, %v682_v41  ;;  %1450 = vmatprep.subr.bf16.mxu0 %v1584_v2 }
 0x33a   : > { %1410 = vmatprep.mubr.msk.f32.mxu1 %vm1583_vm1, %v1582_v1  ;;  %1455 = vmatpush3.bf16.msra.mxu1 %v1454_v60 }
 0x33b   : > { %1456 = vmatprep.subr.bf16.mxu1 %v1584_v2 }
 0x33c   : > { %1452 = vmatpush3.bf16.msra.mxu0 %v1451_v57 }
 0x33d   : > { %1413 = vmatprep.subr.mxu0 %v1582_v1 }
 0x33e   : > { %1458 = vmatpush3.bf16.msra.mxu1 %v1457_v10 }
 0x40a   : > { %v678_v42 = vpop.f32.mrb[4].mxu0 }
 0x40b   : > { %v756_v43 = vmul.f32 0.03125, %v678_v42  ;;  %v1379_v44 = vpop.f32.mrb[5].mxu0 }
 0x40c   : > { %v752_v45 = vpop.f32.mrb[4].mxu1 }
 0x40d   : > { %v758_v46 = vmul.f32 %v756_v43, %v756_v43  ;;  %v757_v47 = vmul.f32 0.03125, %v752_v45  ;;  %v1390_v48 = vpop.f32.mrb[5].mxu1  ;;  %762 = vperm.xlu1 %1511, %v756_v43  }
 0x40f   : > { %v759_v49 = vsub.f32 %v757_v47, %v758_v46 }
 0x411   : > { %v766_v50 = vadd.f32 1e-05, %v759_v49 }
 0x413   : > { %1514 = vrsqrt.f32 %v766_v50 }
 0x41d   : > { %v1515_v53 = vpop.eup %1514 }
 0x41e   : > { %770 = vperm.xlu1 %1511, %v1515_v53  }
 0x48c   : > { %v763_v61 = vpop.permute.xlu1 %762 }
 0x48d   : > { %v765_v62 = vsub.f32 %v608_v40, %v763_v61 }
 0x49d   : > { %v771_v0 = vpop.permute.xlu1 %770 }
 0x49e   : > { %v773_v3 = vmul.f32 %v771_v0, %v765_v62 }
 0x4a0   : > { %v778_v5 = vmul.f32 %v1275_v63, %v773_v3 }
 0x4a2   : > { %v783_v6 = vadd.f32 %v1276_v4, %v778_v5 }
 0x4a4   : > { %v784_v7 = vadd.f32 %v783_v6, %v530_v35 }
 0x4a6   : > { %1400 = vmatmul.mubr.msk.f32.vlgmr.msra.gmra.mrb[6].mxu0 %vm355_vm3, %v784_v7 }
 0x4a7   : > { %1415 = vmatprep.mubr.msk.f32.mxu0 %vm1583_vm1, %v1582_v1  ;;  %1414 = vmatpush3.msk.msra.mxu0 %vm947_vm4, %v269_v16 }
 0x4a8   : > { %1459 = vmatprep.subr.bf16.mxu0 %v1584_v2 }
 0x579   : > { %v858_v12 = vpop.f32.mrb[6].mxu0 }
 0x57a   : > { %v859_v13 = vadd.f32 %v1277_v11, %v858_v12  ;;  %v1401_v14 = vpop.f32.mrb[7].mxu0 }
 0x57c   : > { %v862_v15 = vmax.f32 %v859_v13, 0.0 }
 0x57e   : > { %1411 = vmatmul.mubr.msk.f32.vlgmr.msra.gmra.mrb[6].mxu1 %vm355_vm3, %v862_v15 }
 0x651   : > { %v936_v19 = vpop.f32.mrb[6].mxu1 }
 0x652   : > { %v937_v20 = vadd.f32 %v1279_v17, %v936_v19  ;;  %v1412_v2 = vpop.f32.mrb[7].mxu1 }
 0x654   : > { %v942_v21 = vsub.f32 %v937_v20, %v247_v18  ;;  %941 = vst.msk [vmem:[%s229_s17] sm:$0xff] %vm940_vm5, %v937_v20  ;;  %v1102_v34 = vmul.f32 1.442695, %v937_v20 }
 0x656   : > { %1416 = vmatmul.mubr.msk.f32.vlgmr.msra.gmra.mrb[8].mxu0 %vm943_vm6, %v942_v21  ;;  %1516 = vpow2.f32 %v1102_v34 }
 0x657   : > { %1422 = vmatprep.mubr.msk.f32.mxu0 %vm1583_vm1, %v1582_v1  ;;  %1461 = vmatpush3.bf16.msra.mxu0 %v1460_v24 }
 0x660   : > { %v1517_v35 = vpop.eup %1516 }
 0x729   : > { %v1017_v25 = vpop.f32.mrb[8].mxu0 }
 0x72a   : > { %1022 = vrot.lane.b32.xlu0 %v1017_v25, %s1587_s30  ;;  %v1417_v26 = vpop.f32.mrb[9].mxu0  ;;  %s1522_s30 = sshll.u32 %s1591_s26, 4  ;;  %s1523_s30 = int_to_ptr.vmem [resolvable:$false] %s1522_s30 }
 0x72b   : > { %p1525_p0 = scmp.lt.s32.totalorder %s1165_s13, %s1523_s30 }
 0x72e   : > { %1104 = vrot.lane.b32.xlu0 %v942_v21, %s1588_s6 }
 0x732   : > { %1114 = vrot.lane.b32.xlu0 %v937_v20, %s1589_s9 }
 0x79c   : > { %v1023_v27 = vpop.permute.xlu0 %1022 }
 0x79d   : > { %v1025_v1 = vmul.f32 %v1023_v27, %v937_v20 }
 0x79f   : > { %1027 = vrot.lane.b32.xlu1 %v1025_v1, %s1590_s11 }
 0x7a0   : > { %v1105_v28 = vpop.permute.xlu0 %1104 }
 0x7a1   : > { %v1107_v36 = vmul.f32 %v1517_v35, %v1105_v28 }
 0x7a4   : > { %v1115_v29 = vpop.permute.xlu0 %1114 }
 0x7a5   : > { %v1117_v30 = vsel %vm943_vm6, %v1115_v29, 0.0 }
 0x7a6   : > { %1118 = vadd.xlane.f32.xlu0 %v1117_v30 }
 0x811   : > { %v1028_v31 = vpop.permute.xlu1 %1027 }
 0x812   : > { %1423 = vmatmul.mubr.msk.f32.vlgmr.msra.gmra.mrb[10].mxu0 %vm1029_vm7, %v1028_v31 }
 0x8e5   : > { %v1098_v32 = vpop.f32.mrb[10].mxu0 }
 0x8e6   : > { %1109 = vrot.lane.b32.xlu1 %v1098_v32, %s1588_s6  ;;  %v1424_v33 = vpop.f32.mrb[11].mxu0  ;;  %s1524_s6 = scalar_lea.vmem %s1523_s30, 256 }
 0x8e7   : > { %p1526_p1 = scmp.lt.s32.totalorder %s1524_s6, %s1518_s25 }
 0x8e9   : > { %p1527_p2 = por %p1526_p1, %p1525_p0 }
 0x8eb   : > { %p1528_p3 = pnand %p1527_p2, %p1521_p13 }
 0x958   : > { %v1110_v37 = vpop.permute.xlu1 %1109 }
 0x959   : > { %v1112_v38 = vadd.f32 %v1110_v37, %v1107_v36 }
 0x95b   : > { %v1121_v39 = vmul.f32 %v1112_v38, %v1112_v38 }
 0x95d   : > { %1123 = vrot.lane.b32.xlu1 %v1121_v39, %s1589_s9 }
 0x9cf   : > { %v1124_v40 = vpop.permute.xlu1 %1123 }
 0x9d0   : > { %v1126_v41 = vsel %vm943_vm6, %v1124_v40, 0.0 }
 0x9d1   : > { %1127 = vadd.xlane.f32.xlu1 %v1126_v41 }
 0x9d2   : > { %1531 = shalt.err (!%p1528_p3)
}
 0x9d3   : > { %s1532_s10 = scalar_lea.hbm %s1826_s8, 128  ;;  %s1536_s9 = scalar_lea.hbm %s1873_s4, 256 }
 0x9d4   : > { %p1533_p4 = scmp.ne.s32.totalorder %s1826_s8, %s1532_s10  ;;  %p1537_p9 = scmp.lt.u32.totalorder %s1826_s8, %s1873_s4 }
 0x9d5   : > { %p1538_p10 = scmp.lt.u32.totalorder %s1536_s9, %s1532_s10  ;;  %p1540_p12 = scmp.lt.u32.totalorder %s1532_s10, %s1826_s8 }
 0x9d6   : > { %p1534_p7 = pnand %p1533_p4, %p1660_p5 }
 0x9d7   : > { %p1539_p11 = por %p1538_p10, %p1537_p9 }
 0x9d8   : > { %p1535_p8 = pneg %p1534_p7 }
 0x9d9   : > { %p1541_p13 = por %p1540_p12, %p1539_p11 }
 0x9db   : > { %p1542_p0 = pnand %p1541_p13, %p1535_p8 }
 0x9dd   : > { %1545 = shalt.err (!%p1542_p0)
}
 0x9de   : > { %1462 = dma.vmem_to_hbm [thread:$0]  (%p1660_p5), %s1165_s13, 128, %s1826_s8, %s1148_s23   ;;  %v1133_v42 = vlaneseq  ;;  %v1119_v45 = vpop.xlane.xlu0 %1118  ;;  %vm1145_vm9 = vcmask 0  }
 0x9df   : > { %s1284_s15 = sshll.u32 %s1643_s22, 3  ;;  %v1120_v48 = vsub.f32 0.0, %v1119_v45  ;;  %s245_s22 = scalar_lea.vmem %s1874_s5, %s1678_s7 }
 0x9e0   : > { %v1134_v43 = vshrl.u32 %v1133_v42, 7  ;;  %v1135_v44 = vstv %s1284_s15 }
 0x9e2   : > { %v1136_v46 = vadd.s32 %v1135_v44, %v1134_v43 }
 0x9e4   : > { %vm1137_vm8 = vcmp.lt.s32.totalorder %v1136_v46, 16 }
 0xa5e   : > { %v1128_v47 = vpop.xlane.xlu1 %1127 }
 0xa5f   : > { %v1129_v49 = vmul.f32 0.5, %v1128_v47 }
 0xa61   : > { %v1130_v50 = vadd.f32 %v1129_v49, %v1120_v48 }
 0xa63   : > { %v1131_v51 = vadd.f32 3.675754, %v1130_v50 }
 0xa65   : > { %v1138_v52 = vsel %vm1137_vm8, %v1131_v51, 0.0 }
 0xa66   : > { %v1139_v53 = vrot.slane %v1138_v52, 4 }
 0xa68   : > { %v1140_v54 = vadd.f32 %v1139_v53, %v1138_v52 }
 0xa6a   : > { %v1141_v55 = vrot.slane %v1140_v54, 2 }
 0xa6c   : > { %v1142_v56 = vadd.f32 %v1141_v55, %v1140_v54 }
 0xa6e   : > { %v1143_v57 = vrot.slane %v1142_v56, 1 }
 0xa70   : > { %v1144_v58 = vadd.f32 %v1143_v57, %v1142_v56 }
 0xa72   : > { %1146 = vst.msk [vmem:[%s245_s22] sm:$0x1] %vm1145_vm9, %v1144_v58 }
 0xa73 PF: > { %p1468_p5 = scmp.ge.s32.totalorder %s1580_s21, 2  ;;  %s1179_s16 = sand.u32 1, %s1568_s18  }
 0xa74   : > { %s1180_s8 = scalar_lea.sflag [#allocation3], %s1179_s16 }
 0xa75   : > { %p1465_p1 = pnand %p1468_p5, %p1664_p6 }
 0xa77   : > { %1563 = dma.done.wait (!%p1465_p1), %s1180_s8, 128  }
 0xa78   : > { %1565 = vsyncadd (!%p1465_p1), %s1180_s8, 4294967168  ;;  %p16_p2 = scmp.ge.s32.totalorder %s1647_s24, 4   ;;  %s1877_s18 = smov %s1572_s19 }
 0xa79   : > { %s1878_s19 = smov %s1576_s20  ;;  %s1879_s20 = smov %s1658_s27 }
 0xa7a   : > { %s1880_s21 = smov %s1647_s24  ;;  %18 = sbr.rel (!%p16_p2) target bundleno = 3 (0x3), region = 86 }
 0xa81   :  { %1191 = vsyncpa [#allocation3], 1 }
 0xa82   :  { %1193 = vsyncpa [#allocation3 + $0x1], 1 }

</bundles_post_ra>
